<compile_context>
chip_gen: v6e
topology: v6e:2x2x1
jax: 0.10.0
libtpu: 0.0.40
codegen_flags: <defaults>
</compile_context>

<pallas_src>
import functools

import jax
import jax.numpy as jnp
from jax.experimental import pallas as pl
from jax.experimental.pallas import tpu as pltpu


def _critic_kernel(x_ref, w1_ref, b1_ref, w2_ref, b2_ref, w3r_ref, b3_ref,
                   out_ref):
    # x_ref: (bm, D) bf16 tile of the batch; weights/biases are VMEM-resident.
    x = x_ref[...]                                                  # bf16
    # Layer 1: bf16 x bf16 -> f32 accumulate, bias + ReLU in f32.
    h1 = jnp.dot(x, w1_ref[...], preferred_element_type=jnp.float32)
    h1 = jnp.maximum(h1 + b1_ref[...], 0.0)
    # Layer 2: cast activation to bf16 for the MXU, accumulate in f32.
    h2 = jnp.dot(h1.astype(jnp.bfloat16), w2_ref[...],
                 preferred_element_type=jnp.float32)
    h2 = jnp.maximum(h2 + b2_ref[...], 0.0)
    # Layer 3 in transposed orientation so the store is lane-dense:
    #   out[0, j] = sum_k w3[k] * h2[j, k] + b3
    # dot_general contracts both operands on the H2 axis (no explicit h2.T).
    out_row = jax.lax.dot_general(
        w3r_ref[...], h2,
        dimension_numbers=(((1,), (1,)), ((), ())),
        preferred_element_type=jnp.float32)                          # (1, bm)
    out_ref[...] = (out_row + b3_ref[...]).astype(out_ref.dtype)


@functools.partial(jax.jit, static_argnames=("block_m",))
def critic_forward(state, w1, b1, w2, b2, w3, b3, *, block_m=2048):
    """state: (B, input_dim) f32 -> (B, 1) f32. Weights stored as (in, out)."""
    B, D = state.shape
    H1 = w1.shape[1]
    H2 = w2.shape[1]

    assert block_m % 128 == 0, "block_m must be a multiple of 128"
    # Smallest number of 128-row tiles that covers the batch.
    rows_128 = pl.cdiv(B, 128)
    # Keep >= 2 grid steps whenever the batch allows it (feeds both
    # TensorCores on v7x via the "parallel" grid axis); cap at block_m.
    bm = min(block_m, max(128, pl.cdiv(rows_128, 2) * 128))
    grid_m = pl.cdiv(B, bm)

    # bf16 MXU operands (f32 accumulation happens inside the kernel).
    state_bf = state.astype(jnp.bfloat16)
    w1_bf = w1.astype(jnp.bfloat16)
    w2_bf = w2.astype(jnp.bfloat16)

    # Biases / final weight as rows so they broadcast cleanly in the kernel.
    b1r = b1.reshape(1, H1)
    b2r = b2.reshape(1, H2)
    w3r = w3.reshape(1, H2)   # (H2, 1) column -> (1, H2) row, same values
    b3r = b3.reshape(1, 1)

    # Parameters never change across the grid: constant index_map + single
    # buffer (no double-buffer copy of the weights in VMEM).
    param_mode = pl.Buffered(1)

    out = pl.pallas_call(
        _critic_kernel,
        out_shape=jax.ShapeDtypeStruct((1, grid_m * bm), jnp.float32),
        grid_spec=pltpu.PrefetchScalarGridSpec(
            num_scalar_prefetch=0,
            grid=(grid_m,),
            in_specs=[
                # streamed batch tile of the state (ragged tail tile allowed;
                # rows are independent so junk tail rows never contaminate
                # valid rows, and the wrapper slices them off)
                pl.BlockSpec((bm, D), lambda i: (i, 0)),
                # parameters: full arrays, same block every step (VMEM resident)
                pl.BlockSpec((D, H1), lambda i: (0, 0), pipeline_mode=param_mode),
                pl.BlockSpec((1, H1), lambda i: (0, 0), pipeline_mode=param_mode),
                pl.BlockSpec((H1, H2), lambda i: (0, 0), pipeline_mode=param_mode),
                pl.BlockSpec((1, H2), lambda i: (0, 0), pipeline_mode=param_mode),
                pl.BlockSpec((1, H2), lambda i: (0, 0), pipeline_mode=param_mode),
                pl.BlockSpec((1, 1), lambda i: (0, 0), pipeline_mode=param_mode),
            ],
            # lane-dense (1, bm) output row per grid step
            out_specs=pl.BlockSpec((1, bm), lambda i: (0, i)),
        ),
        compiler_params=pltpu.CompilerParams(
            dimension_semantics=("parallel",)),
    )(state_bf, w1_bf, b1r, w2_bf, b2r, w3r, b3r)

    return out[0, :B].reshape(B, 1)


def init_linear(key, fan_in, fan_out):
    """Deterministic init mimicking PyTorch nn.Linear default (uniform +-1/sqrt(fan_in))."""
    kw, kb = jax.random.split(key)
    bound = 1.0 / jnp.sqrt(fan_in)
    w = jax.random.uniform(kw, (fan_in, fan_out), jnp.float32, -bound, bound)
    b = jax.random.uniform(kb, (fan_out,), jnp.float32, -bound, bound)
    return w, b


if __name__ == "__main__":
    key = jax.random.PRNGKey(0)
    k_x, k1, k2, k3 = jax.random.split(key, 4)

    batch = 2
    input_dim = 8        # corresponds to CriticNwk(input_dim=(8,), ...)
    hidden1 = 256
    hidden2 = 256

    state = jax.random.normal(k_x, (batch, input_dim), jnp.float32)
    w1, b1 = init_linear(k1, input_dim, hidden1)
    w2, b2 = init_linear(k2, hidden1, hidden2)
    w3, b3 = init_linear(k3, hidden2, 1)

    out = critic_forward(state, w1, b1, w2, b2, w3, b3)
    jax.block_until_ready(out)

    # Reference check in plain JAX (same math as the PyTorch module, in f32).
    # Tolerance loosened because the kernel feeds the MXU bf16 operands
    # (f32 accumulation); observed error is ~1e-3, allow 2e-2.
    ref = jnp.maximum(state @ w1 + b1, 0.0)
    ref = jnp.maximum(ref @ w2 + b2, 0.0)
    ref = ref @ w3 + b3
    assert out.shape == (batch, 1)
    assert jnp.allclose(out, ref, atol=2e-2, rtol=2e-2)

    print("KERNEL_OK")
</pallas_src>

<mosaic_0001>
module attributes {stable_mosaic.version = 11 : i64} {
  func.func @_critic_kernel(%arg0: i32, %arg1: memref<128x8xbf16, #tpu.memory_space<vmem>>, %arg2: memref<8x256xbf16, #tpu.memory_space<vmem>>, %arg3: memref<1x256xf32, #tpu.memory_space<vmem>>, %arg4: memref<256x256xbf16, #tpu.memory_space<vmem>>, %arg5: memref<1x256xf32, #tpu.memory_space<vmem>>, %arg6: memref<1x256xf32, #tpu.memory_space<vmem>>, %arg7: memref<1x1xf32, #tpu.memory_space<vmem>>, %arg8: memref<1x128xf32, #tpu.memory_space<vmem>>) attributes {dimension_semantics = [#tpu.dimension_semantics<parallel>], iteration_bounds = array<i64: 1>, scalar_prefetch = 0 : i64, scratch_operands = 0 : i64, tpu.core_type = #tpu.core_type<tc>, window_params = [{transform_indices = @transform_0, window_bounds = array<i64: 128, 8>}, {pipeline_mode = #tpu.pipeline_mode<synchronous>, transform_indices = @transform_1, window_bounds = array<i64: 8, 256>}, {pipeline_mode = #tpu.pipeline_mode<synchronous>, transform_indices = @transform_2, window_bounds = array<i64: 1, 256>}, {pipeline_mode = #tpu.pipeline_mode<synchronous>, transform_indices = @transform_3, window_bounds = array<i64: 256, 256>}, {pipeline_mode = #tpu.pipeline_mode<synchronous>, transform_indices = @transform_4, window_bounds = array<i64: 1, 256>}, {pipeline_mode = #tpu.pipeline_mode<synchronous>, transform_indices = @transform_5, window_bounds = array<i64: 1, 256>}, {pipeline_mode = #tpu.pipeline_mode<synchronous>, transform_indices = @transform_6, window_bounds = array<i64: 1, 1>}, {transform_indices = @transform_7, window_bounds = array<i64: 1, 128>}]} {
    %c0 = arith.constant 0 : index
    %c0_0 = arith.constant 0 : index
    %0 = vector.load %arg1[%c0, %c0_0] : memref<128x8xbf16, #tpu.memory_space<vmem>>, vector<128x8xbf16>
    %c0_1 = arith.constant 0 : index
    %c0_2 = arith.constant 0 : index
    %1 = vector.load %arg2[%c0_1, %c0_2] : memref<8x256xbf16, #tpu.memory_space<vmem>>, vector<8x256xbf16>
    %cst = arith.constant dense<0.000000e+00> : vector<128x256xf32>
    %2 = tpu.matmul %0, %1, %cst {dimension_numbers = #tpu.dot_dimension_numbers<[1], [0], [0], [1], [0, 0, 1, 1], [], []>} : vector<128x8xbf16>, vector<8x256xbf16>, vector<128x256xf32> -> vector<128x256xf32>
    %c0_3 = arith.constant 0 : index
    %c0_4 = arith.constant 0 : index
    %3 = vector.load %arg3[%c0_3, %c0_4] : memref<1x256xf32, #tpu.memory_space<vmem>>, vector<1x256xf32>
    %4 = vector.broadcast %3 : vector<1x256xf32> to vector<128x256xf32>
    %5 = arith.addf %2, %4 : vector<128x256xf32>
    %cst_5 = arith.constant 0.000000e+00 : f32
    %6 = vector.broadcast %cst_5 : f32 to vector<128x256xf32>
    %7 = arith.maximumf %5, %6 : vector<128x256xf32>
    %8 = arith.truncf %7 : vector<128x256xf32> to vector<128x256xbf16>
    %c0_6 = arith.constant 0 : index
    %c0_7 = arith.constant 0 : index
    %9 = vector.load %arg4[%c0_6, %c0_7] : memref<256x256xbf16, #tpu.memory_space<vmem>>, vector<256x256xbf16>
    %cst_8 = arith.constant dense<0.000000e+00> : vector<128x256xf32>
    %10 = tpu.matmul %8, %9, %cst_8 {dimension_numbers = #tpu.dot_dimension_numbers<[1], [0], [0], [1], [0, 0, 1, 1], [], []>} : vector<128x256xbf16>, vector<256x256xbf16>, vector<128x256xf32> -> vector<128x256xf32>
    %c0_9 = arith.constant 0 : index
    %c0_10 = arith.constant 0 : index
    %11 = vector.load %arg5[%c0_9, %c0_10] : memref<1x256xf32, #tpu.memory_space<vmem>>, vector<1x256xf32>
    %12 = vector.broadcast %11 : vector<1x256xf32> to vector<128x256xf32>
    %13 = arith.addf %10, %12 : vector<128x256xf32>
    %cst_11 = arith.constant 0.000000e+00 : f32
    %14 = vector.broadcast %cst_11 : f32 to vector<128x256xf32>
    %15 = arith.maximumf %13, %14 : vector<128x256xf32>
    %c0_12 = arith.constant 0 : index
    %c0_13 = arith.constant 0 : index
    %16 = vector.load %arg6[%c0_12, %c0_13] : memref<1x256xf32, #tpu.memory_space<vmem>>, vector<1x256xf32>
    %cst_14 = arith.constant dense<0.000000e+00> : vector<1x128xf32>
    %17 = tpu.matmul %16, %15, %cst_14 {dimension_numbers = #tpu.dot_dimension_numbers<[1], [1], [0], [0], [0, 0, 1, 0], [], []>} : vector<1x256xf32>, vector<128x256xf32>, vector<1x128xf32> -> vector<1x128xf32>
    %c0_15 = arith.constant 0 : index
    %c0_16 = arith.constant 0 : index
    %18 = vector.load %arg7[%c0_15, %c0_16] : memref<1x1xf32, #tpu.memory_space<vmem>>, vector<1x1xf32>
    %19 = vector.broadcast %18 : vector<1x1xf32> to vector<1x128xf32>
    %20 = arith.addf %17, %19 : vector<1x128xf32>
    %c0_17 = arith.constant 0 : index
    %c0_18 = arith.constant 0 : index
    %21 = vector.load %arg8[%c0_17, %c0_18] : memref<1x128xf32, #tpu.memory_space<vmem>>, vector<1x128xf32>
    tpu.vector_store %arg8[%c0_17, %c0_18], %20 {strides = array<i32>} : memref<1x128xf32, #tpu.memory_space<vmem>>, vector<1x128xf32>,
    return
  }
  func.func @transform_0(%arg0: i32) -> (i32, i32) {
    %c0_i32 = arith.constant 0 : i32
    %c0_i32_0 = arith.constant 0 : i32
    return %arg0, %c0_i32 : i32, i32
  }
  func.func @transform_1(%arg0: i32) -> (i32, i32) {
    %c0_i32 = arith.constant 0 : i32
    %c0_i32_0 = arith.constant 0 : i32
    %c0_i32_1 = arith.constant 0 : i32
    return %c0_i32, %c0_i32_0 : i32, i32
  }
  func.func @transform_2(%arg0: i32) -> (i32, i32) {
    %c0_i32 = arith.constant 0 : i32
    %c0_i32_0 = arith.constant 0 : i32
    %c0_i32_1 = arith.constant 0 : i32
    return %c0_i32, %c0_i32_0 : i32, i32
  }
  func.func @transform_3(%arg0: i32) -> (i32, i32) {
    %c0_i32 = arith.constant 0 : i32
    %c0_i32_0 = arith.constant 0 : i32
    %c0_i32_1 = arith.constant 0 : i32
    return %c0_i32, %c0_i32_0 : i32, i32
  }
  func.func @transform_4(%arg0: i32) -> (i32, i32) {
    %c0_i32 = arith.constant 0 : i32
    %c0_i32_0 = arith.constant 0 : i32
    %c0_i32_1 = arith.constant 0 : i32
    return %c0_i32, %c0_i32_0 : i32, i32
  }
  func.func @transform_5(%arg0: i32) -> (i32, i32) {
    %c0_i32 = arith.constant 0 : i32
    %c0_i32_0 = arith.constant 0 : i32
    %c0_i32_1 = arith.constant 0 : i32
    return %c0_i32, %c0_i32_0 : i32, i32
  }
  func.func @transform_6(%arg0: i32) -> (i32, i32) {
    %c0_i32 = arith.constant 0 : i32
    %c0_i32_0 = arith.constant 0 : i32
    %c0_i32_1 = arith.constant 0 : i32
    return %c0_i32, %c0_i32_0 : i32, i32
  }
  func.func @transform_7(%arg0: i32) -> (i32, i32) {
    %c0_i32 = arith.constant 0 : i32
    %c0_i32_0 = arith.constant 0 : i32
    return %c0_i32, %arg0 : i32, i32
  }
}

</mosaic_0001>

<bundles_post_ra>
// kernel: critic_forward.1
= control target key start
LH: loop header
LB: loop body
LE: loop exit
PB: predicated region body
PF: predicated region fallthrough
CT: control target
= control target key end

     0   :  { %v96_v0 = vlaneseq  ;;  %vm592_vm0 = vcmask 1043456   ;;  %v1302_v2 = vmov 0   ;;  %v1303_v5 = vmov 1966171168   ;;  %s1859_s1 = inlined_call_operand.vmem [shape: bf16[8,256], index: 1, kind: input, shape index: {}]   ;;  %s1860_s0 = inlined_call_operand.vmem [shape: bf16[2,8], index: 0, kind: input, shape index: {}]   ;;  %s1861_s3 = inlined_call_operand.vmem [shape: bf16[256,256], index: 3, kind: input, shape index: {}]   ;;  %s1862_s2 = inlined_call_operand.vmem [shape: f32[1,256], index: 2, kind: input, shape index: {}]   ;;  %s1863_s5 = inlined_call_operand.vmem [shape: f32[1,256], index: 5, kind: input, shape index: {}]   ;;  %s1864_s6 = inlined_call_operand.<no memory space> [shape: f32[1,1], index: 6, kind: input, shape index: {}]   ;;  %s1865_s4 = inlined_call_operand.vmem [shape: f32[1,256], index: 4, kind: input, shape index: {}]   ;;  %s1866_s7 = inlined_call_operand.vmem [shape: f32[1,128], index: 7, kind: output, shape index: {}]  }
   0x1   :  { %v93_v1 = vld [vmem:[%s1859_s1] sm:$0xff]  ;;  %631 = vmatprep.mubr.bf16.mxu0 %v1302_v2  ;;  %v175_v6 = vunpack.c.l.s4 %v1303_v5  ;;  %1251 = vset.pattern.permute.xlu0 %v1302_v2  ;;  %v37_v22 = vld [vmem:[%s1860_s0 + $0x8] sm:$0x1]  ;;  %v38_v23 = vld [vmem:[%s1860_s0 + $0x9] sm:$0x1]  ;;  %vm567_vm1 = vcmask 64512  }
   0x2   :  { %v29_v3 = vld [vmem:[%s1860_s0] sm:$0x1]  ;;  %v30_v4 = vld [vmem:[%s1860_s0 + $0x1] sm:$0x1]  ;;  %v1207_v7 = vcombine.high %v93_v1, %v93_v1  ;;  %v1206_v8 = vcombine.low %v93_v1, %v93_v1  ;;  %v31_v9 = vld [vmem:[%s1860_s0 + $0x2] sm:$0x1]  ;;  %v219_v27 = vcombine.low %v37_v22, %v38_v23 }
   0x3   :  { %v32_v10 = vld [vmem:[%s1860_s0 + $0x3] sm:$0x1]  ;;  %v33_v11 = vld [vmem:[%s1860_s0 + $0x4] sm:$0x1]  ;;  %v34_v12 = vld [vmem:[%s1860_s0 + $0x5] sm:$0x1]  ;;  %v170_v15 = vcombine.low %v29_v3, %v30_v4  ;;  %v176_v17 = vunpack.c.0.s8 %v175_v6 }
   0x4   :  { %v35_v13 = vld [vmem:[%s1860_s0 + $0x6] sm:$0x1]  ;;  %v36_v14 = vld [vmem:[%s1860_s0 + $0x7] sm:$0x1]  ;;  %v171_v16 = vcombine.low %v31_v9, %v32_v10  ;;  %1208 = vmatprep.subr.msk.bf16.mxu0 %vm592_vm0, %v1207_v7  ;;  %v594_v18 = vsel %vm592_vm0, %v1206_v8, 0  ;;  %v1375_v19 = vshrl.u32 %v96_v0, 7  ;;  %v172_v20 = vcombine.low %v33_v11, %v34_v12 }
   0x5   :  { %v173_v21 = vcombine.low %v35_v13, %v36_v14  ;;  %614 = vmatpush1.bf16.msra.mxu0 %v594_v18  ;;  %v39_v24 = vld [vmem:[%s1860_s0 + $0xa] sm:$0x1]  ;;  %v40_v25 = vld [vmem:[%s1860_s0 + $0xb] sm:$0x1]  ;;  %v41_v26 = vld [vmem:[%s1860_s0 + $0xc] sm:$0x1] }
   0x6   :  { %v1393_v28 = vsub.s32 %v176_v17, %v1375_v19  ;;  %v42_v29 = vld [vmem:[%s1860_s0 + $0xd] sm:$0x1]  ;;  %v43_v30 = vld [vmem:[%s1860_s0 + $0xe] sm:$0x1]  ;;  %v44_v31 = vld [vmem:[%s1860_s0 + $0xf] sm:$0x1]  ;;  %v220_v32 = vcombine.low %v39_v24, %v40_v25 }
   0x7   :  { %v221_v33 = vcombine.low %v41_v26, %v42_v29  ;;  %v222_v34 = vcombine.low %v43_v30, %v44_v31  ;;  %v45_v35 = vld [vmem:[%s1860_s0 + $0x10] sm:$0x1]  ;;  %v46_v36 = vld [vmem:[%s1860_s0 + $0x11] sm:$0x1]  ;;  %v47_v41 = vld [vmem:[%s1860_s0 + $0x12] sm:$0x1] }
   0x8   :  { %v180_v37 = vrot.slane %v170_v15, %v1393_v28  ;;  %v187_v38 = vrot.slane %v171_v16, %v1393_v28  ;;  %v194_v39 = vrot.slane %v172_v20, %v1393_v28  ;;  %v201_v40 = vrot.slane %v173_v21, %v1393_v28  ;;  %v48_v42 = vld [vmem:[%s1860_s0 + $0x13] sm:$0x1]  ;;  %v49_v43 = vld [vmem:[%s1860_s0 + $0x14] sm:$0x1]  ;;  %v50_v48 = vld [vmem:[%s1860_s0 + $0x15] sm:$0x1] }
   0x9   :  { %v229_v44 = vrot.slane %v219_v27, %v1393_v28  ;;  %v236_v45 = vrot.slane %v220_v32, %v1393_v28  ;;  %v243_v46 = vrot.slane %v221_v33, %v1393_v28  ;;  %v250_v47 = vrot.slane %v222_v34, %v1393_v28  ;;  %v51_v49 = vld [vmem:[%s1860_s0 + $0x16] sm:$0x1]  ;;  %v52_v50 = vld [vmem:[%s1860_s0 + $0x17] sm:$0x1]  ;;  %v53_v0 = vld [vmem:[%s1860_s0 + $0x18] sm:$0x1] }
   0xa   :  { %v202_v51 = vcombine.low %v180_v37, %v187_v38  ;;  %v203_v52 = vcombine.low %v194_v39, %v201_v40  ;;  %v268_v55 = vcombine.low %v45_v35, %v46_v36  ;;  %v269_v56 = vcombine.low %v47_v41, %v48_v42  ;;  %v54_v1 = vld [vmem:[%s1860_s0 + $0x19] sm:$0x1]  ;;  %v55_v7 = vld [vmem:[%s1860_s0 + $0x1a] sm:$0x1]  ;;  %v56_v8 = vld [vmem:[%s1860_s0 + $0x1b] sm:$0x1] }
   0xb   :  { %v251_v53 = vcombine.low %v229_v44, %v236_v45  ;;  %v252_v54 = vcombine.low %v243_v46, %v250_v47  ;;  %v270_v59 = vcombine.low %v49_v43, %v50_v48  ;;  %v271_v60 = vcombine.low %v51_v49, %v52_v50  ;;  %v57_v9 = vld [vmem:[%s1860_s0 + $0x1c] sm:$0x1]  ;;  %v58_v10 = vld [vmem:[%s1860_s0 + $0x1d] sm:$0x1]  ;;  %v59_v11 = vld [vmem:[%s1860_s0 + $0x1e] sm:$0x1] }
   0xc   :  { %v210_v57 = vrot.slane %v202_v51, %v1393_v28  ;;  %v217_v58 = vrot.slane %v203_v52, %v1393_v28  ;;  %v278_v62 = vrot.slane %v268_v55, %v1393_v28  ;;  %v285_v63 = vrot.slane %v269_v56, %v1393_v28  ;;  %v60_v12 = vld [vmem:[%s1860_s0 + $0x1f] sm:$0x1]  ;;  %v61_v21 = vld [vmem:[%s1860_s0 + $0x20] sm:$0x1]  ;;  %v62_v22 = vld [vmem:[%s1860_s0 + $0x21] sm:$0x1] }
   0xd   :  { %v259_v3 = vrot.slane %v251_v53, %v1393_v28  ;;  %v266_v4 = vrot.slane %v252_v54, %v1393_v28  ;;  %v292_v5 = vrot.slane %v270_v59, %v1393_v28  ;;  %v299_v6 = vrot.slane %v271_v60, %v1393_v28  ;;  %v63_v23 = vld [vmem:[%s1860_s0 + $0x22] sm:$0x1]  ;;  %v64_v24 = vld [vmem:[%s1860_s0 + $0x23] sm:$0x1]  ;;  %v65_v27 = vld [vmem:[%s1860_s0 + $0x24] sm:$0x1] }
   0xe   :  { %v218_v61 = vcombine.low %v210_v57, %v217_v58  ;;  %v300_v13 = vcombine.low %v278_v62, %v285_v63  ;;  %v317_v14 = vcombine.low %v53_v0, %v54_v1  ;;  %v318_v15 = vcombine.low %v55_v7, %v56_v8  ;;  %v66_v29 = vld [vmem:[%s1860_s0 + $0x25] sm:$0x1]  ;;  %v67_v30 = vld [vmem:[%s1860_s0 + $0x26] sm:$0x1]  ;;  %v1254_v31 = vld [vmem:[%s1861_s3 + $0x74] ss:$8 sps:$4 sm:$0xff]  }
   0xf   :  { %v267_v16 = vcombine.low %v259_v3, %v266_v4  ;;  %v301_v17 = vcombine.low %v292_v5, %v299_v6  ;;  %v319_v18 = vcombine.low %v57_v9, %v58_v10  ;;  %v320_v20 = vcombine.low %v59_v11, %v60_v12  ;;  %v1256_v36 = vld [vmem:[%s1861_s3 + $0x70] ss:$8 sps:$4 sm:$0xff]   ;;  %v68_v37 = vld [vmem:[%s1860_s0 + $0x27] sm:$0x1]  ;;  %964 = vmatprep.subr.bf16.mxu1 %v1254_v31  ;;  %v1259_v42 = vld [vmem:[%s1861_s3 + $0x60] ss:$8 sps:$4 sm:$0xff]  }
  0x10   :  { %1209 = vmatmul.mubr.msk.bf16.vlgmr.msra.gmra.mxu0 %vm567_vm1, %v218_v61  ;;  %v327_v25 = vrot.slane %v317_v14, %v1393_v28  ;;  %v334_v26 = vrot.slane %v318_v15, %v1393_v28  ;;  %v308_v32 = vrot.slane %v300_v13, %v1393_v28  ;;  %v1257_v38 = vld [vmem:[%s1861_s3 + $0x64] ss:$8 sps:$4 sm:$0xff]   ;;  %v366_v40 = vcombine.low %v61_v21, %v62_v22  ;;  %v1260_v47 = vld [vmem:[%s1861_s3 + $0x54] ss:$8 sps:$4 sm:$0xff]   ;;  %v69_v48 = vld [vmem:[%s1860_s0 + $0x28] sm:$0x1] }
  0x11   :  { %641 = vmatprep.mubr.bf16.mxu0 %v1302_v2  ;;  %v315_v33 = vrot.slane %v301_v17, %v1393_v28  ;;  %v341_v34 = vrot.slane %v319_v18, %v1393_v28  ;;  %v348_v35 = vrot.slane %v320_v20, %v1393_v28  ;;  %v367_v41 = vcombine.low %v63_v23, %v64_v24  ;;  %v70_v49 = vld [vmem:[%s1860_s0 + $0x29] sm:$0x1]  ;;  %v71_v50 = vld [vmem:[%s1860_s0 + $0x2a] sm:$0x1]  ;;  %v72_v51 = vld [vmem:[%s1860_s0 + $0x2b] sm:$0x1] }
  0x12   :  { %v349_v39 = vcombine.low %v327_v25, %v334_v26  ;;  %965 = vmatpush1.bf16.msra.mxu1 %v1256_v36  ;;  %v368_v45 = vcombine.low %v65_v27, %v66_v29  ;;  %v369_v46 = vcombine.low %v67_v30, %v68_v37  ;;  %v376_v53 = vrot.slane %v366_v40, %v1393_v28  ;;  %v73_v55 = vld [vmem:[%s1860_s0 + $0x2c] sm:$0x1]  ;;  %v74_v56 = vld [vmem:[%s1860_s0 + $0x2d] sm:$0x1]  ;;  %v1262_v57 = vld [vmem:[%s1861_s3 + $0x50] ss:$8 sps:$4 sm:$0xff]  }
  0x13   :  { %v316_v43 = vcombine.low %v308_v32, %v315_v33  ;;  %v350_v44 = vcombine.low %v341_v34, %v348_v35  ;;  %966 = vmatprep.subr.bf16.mxu1 %v1257_v38  ;;  %v383_v54 = vrot.slane %v367_v41, %v1393_v28  ;;  %v1263_v61 = vld [vmem:[%s1861_s3 + $0x44] ss:$8 sps:$4 sm:$0xff]   ;;  %v415_v1 = vcombine.low %v69_v48, %v70_v49  ;;  %v1265_v4 = vld [vmem:[%s1861_s3 + $0x40] ss:$8 sps:$4 sm:$0xff]   ;;  %v1266_v9 = vld [vmem:[%s1861_s3 + $0x34] ss:$8 sps:$4 sm:$0xff]  }
  0x14   :  { %v357_v52 = vrot.slane %v349_v39, %v1393_v28  ;;  %v390_v59 = vrot.slane %v368_v45, %v1393_v28  ;;  %v397_v60 = vrot.slane %v369_v46, %v1393_v28  ;;  %v75_v62 = vld [vmem:[%s1860_s0 + $0x2e] sm:$0x1]  ;;  %v76_v63 = vld [vmem:[%s1860_s0 + $0x2f] sm:$0x1]  ;;  %v416_v3 = vcombine.low %v71_v50, %v72_v51  ;;  %v77_v10 = vld [vmem:[%s1860_s0 + $0x30] sm:$0x1] }
  0x15   :  { %v364_v58 = vrot.slane %v350_v44, %v1393_v28  ;;  %v398_v0 = vcombine.low %v376_v53, %v383_v54  ;;  %v417_v7 = vcombine.low %v73_v55, %v74_v56  ;;  %v418_v8 = vcombine.low %v75_v62, %v76_v63  ;;  %v78_v11 = vld [vmem:[%s1860_s0 + $0x31] sm:$0x1]  ;;  %v79_v12 = vld [vmem:[%s1860_s0 + $0x32] sm:$0x1]  ;;  %v80_v13 = vld [vmem:[%s1860_s0 + $0x33] sm:$0x1] }
  0x16   :  { %967 = vmatpush1.bf16.msra.mxu1 %v1259_v42  ;;  %v399_v6 = vcombine.low %v390_v59, %v397_v60  ;;  %v425_v15 = vrot.slane %v415_v1, %v1393_v28  ;;  %v81_v17 = vld [vmem:[%s1860_s0 + $0x34] sm:$0x1]  ;;  %v82_v18 = vld [vmem:[%s1860_s0 + $0x35] sm:$0x1]  ;;  %v83_v20 = vld [vmem:[%s1860_s0 + $0x36] sm:$0x1]  ;;  %v464_v29 = vcombine.low %v77_v10, %v78_v11  ;;  %v465_v30 = vcombine.low %v79_v12, %v80_v13 }
  0x17   :  { %968 = vmatprep.subr.bf16.mxu1 %v1260_v47  ;;  %v365_v5 = vcombine.low %v357_v52, %v364_v58  ;;  %v406_v14 = vrot.slane %v398_v0, %v1393_v28  ;;  %v1268_v21 = vld [vmem:[%s1861_s3 + $0x30] ss:$8 sps:$4 sm:$0xff]   ;;  %v439_v23 = vrot.slane %v417_v7, %v1393_v28  ;;  %v446_v24 = vrot.slane %v418_v8, %v1393_v28  ;;  %v84_v25 = vld [vmem:[%s1860_s0 + $0x37] sm:$0x1]  ;;  %v1269_v26 = vld [vmem:[%s1861_s3 + $0x24] ss:$8 sps:$4 sm:$0xff]  }
  0x18   :  { %1210 = vmatmul.mubr.msk.bf16.gmra.mxu0 %vm567_vm1, %v267_v16  ;;  %v432_v16 = vrot.slane %v416_v3, %v1393_v28  ;;  %v413_v22 = vrot.slane %v399_v6, %v1393_v28  ;;  %v1271_v31 = vld [vmem:[%s1861_s3 + $0x20] ss:$8 sps:$4 sm:$0xff]   ;;  %v466_v34 = vcombine.low %v81_v17, %v82_v18  ;;  %v467_v35 = vcombine.low %v83_v20, %v84_v25  ;;  %v1272_v36 = vld [vmem:[%s1861_s3 + $0x14] ss:$8 sps:$4 sm:$0xff]   ;;  %v85_v37 = vld [vmem:[%s1860_s0 + $0x38] sm:$0x1] }
  0x19   :  { %651 = vmatprep.mubr.bf16.mxu0 %v1302_v2  ;;  %v448_v33 = vcombine.low %v439_v23, %v446_v24  ;;  %v86_v38 = vld [vmem:[%s1860_s0 + $0x39] sm:$0x1]  ;;  %v474_v40 = vrot.slane %v464_v29, %v1393_v28  ;;  %v481_v41 = vrot.slane %v465_v30, %v1393_v28  ;;  %v87_v42 = vld [vmem:[%s1860_s0 + $0x3a] sm:$0x1]  ;;  %v89_v48 = vld [vmem:[%s1860_s0 + $0x3c] sm:$0x1] }
  0x1a   :  { %969 = vmatpush1.bf16.msra.mxu1 %v1262_v57  ;;  %v447_v27 = vcombine.low %v425_v15, %v432_v16  ;;  %v414_v32 = vcombine.low %v406_v14, %v413_v22  ;;  %v1274_v44 = vld [vmem:[%s1861_s3 + $0x10] ss:$8 sps:$4 sm:$0xff]   ;;  %v488_v46 = vrot.slane %v466_v34, %v1393_v28  ;;  %v495_v47 = vrot.slane %v467_v35, %v1393_v28  ;;  %v90_v49 = vld [vmem:[%s1860_s0 + $0x3d] sm:$0x1]  ;;  %v1275_v50 = vld [vmem:[%s1861_s3 + $0x4] ss:$8 sps:$4 sm:$0xff]  }
  0x1b   :  { %970 = vmatprep.subr.bf16.mxu1 %v1263_v61  ;;  %v462_v45 = vrot.slane %v448_v33, %v1393_v28  ;;  %v91_v51 = vld [vmem:[%s1860_s0 + $0x3e] sm:$0x1]  ;;  %v92_v52 = vld [vmem:[%s1860_s0 + $0x3f] sm:$0x1]  ;;  %v513_v53 = vcombine.low %v85_v37, %v86_v38  ;;  %v515_v55 = vcombine.low %v89_v48, %v90_v49  ;;  %v1277_v56 = vld [vmem:[%s1861_s3] ss:$8 sps:$4 sm:$0xff]   ;;  %v496_v58 = vcombine.low %v474_v40, %v481_v41 }
  0x1c   :  { %v455_v39 = vrot.slane %v447_v27, %v1393_v28  ;;  %v497_v59 = vcombine.low %v488_v46, %v495_v47  ;;  %v516_v60 = vcombine.low %v91_v51, %v92_v52  ;;  %v1278_v61 = vld [vmem:[%s1861_s3 + $0xf4] ss:$8 sps:$4 sm:$0xff]   ;;  %v1280_v1 = vld [vmem:[%s1861_s3 + $0xf0] ss:$8 sps:$4 sm:$0xff]   ;;  %v1281_v6 = vld [vmem:[%s1861_s3 + $0xe4] ss:$8 sps:$4 sm:$0xff]  }
  0x1d   :  { %v523_v62 = vrot.slane %v513_v53, %v1393_v28  ;;  %v537_v0 = vrot.slane %v515_v55, %v1393_v28  ;;  %v504_v3 = vrot.slane %v496_v58, %v1393_v28  ;;  %v1283_v7 = vld [vmem:[%s1861_s3 + $0xe0] ss:$8 sps:$4 sm:$0xff]   ;;  %v1284_v11 = vld [vmem:[%s1861_s3 + $0xd4] ss:$8 sps:$4 sm:$0xff]   ;;  %v1286_v12 = vld [vmem:[%s1861_s3 + $0xd0] ss:$8 sps:$4 sm:$0xff]  }
  0x1e   :  { %971 = vmatpush1.bf16.msra.mxu1 %v1265_v4  ;;  %v463_v57 = vcombine.low %v455_v39, %v462_v45  ;;  %v511_v4 = vrot.slane %v497_v59, %v1393_v28  ;;  %v1287_v15 = vld [vmem:[%s1861_s3 + $0xc4] ss:$8 sps:$4 sm:$0xff]   ;;  %v1289_v16 = vld [vmem:[%s1861_s3 + $0xc0] ss:$8 sps:$4 sm:$0xff]   ;;  %v1290_v18 = vld [vmem:[%s1861_s3 + $0xb4] ss:$8 sps:$4 sm:$0xff]  }
  0x1f   :  { %972 = vmatprep.subr.bf16.mxu1 %v1266_v9  ;;  %v1295_v20 = vld [vmem:[%s1861_s3 + $0xa0] ss:$8 sps:$4 sm:$0xff]   ;;  %v1298_v22 = vld [vmem:[%s1861_s3 + $0x90] ss:$8 sps:$4 sm:$0xff]   ;;  %v1299_v23 = vld [vmem:[%s1861_s3 + $0x84] ss:$8 sps:$4 sm:$0xff]  }
  0x20   :  { %1211 = vmatmul.mubr.msk.bf16.gmra.mxu0 %vm567_vm1, %v316_v43  ;;  %v88_v43 = vld [vmem:[%s1860_s0 + $0x3b] sm:$0x1]  ;;  %v512_v8 = vcombine.low %v504_v3, %v511_v4  ;;  %v1301_v24 = vld [vmem:[%s1861_s3 + $0x80] ss:$8 sps:$4 sm:$0xff]   ;;  %v1708_v25 = vsub.s32 1, %v1375_v19 }
  0x21   :  { %661 = vmatprep.mubr.bf16.mxu0 %v1302_v2  ;;  %v514_v54 = vcombine.low %v87_v42, %v88_v43  ;;  %v94_v27 = vld [vmem:[%s1862_s2] sm:$0x3] }
  0x22   :  { %973 = vmatpush1.bf16.msra.mxu1 %v1268_v21  ;;  %v1296_v21 = vld [vmem:[%s1861_s3 + $0x94] ss:$8 sps:$4 sm:$0xff]   ;;  %v1717_v30 = vrot.slane %v94_v27, %v1708_v25 }
  0x23   :  { %974 = vmatprep.subr.bf16.mxu1 %v1269_v26  ;;  %v530_v63 = vrot.slane %v514_v54, %v1393_v28  ;;  %v1711_v26 = vsub.s32 0, %v1375_v19 }
  0x25   :  { %v545_v9 = vcombine.low %v523_v62, %v530_v63 }
  0x26   :  { %975 = vmatpush1.bf16.msra.mxu1 %v1271_v31  ;;  %v1720_v31 = vrot.slane %v94_v27, %v1711_v26 }
  0x27   :  { %976 = vmatprep.subr.bf16.mxu1 %v1272_v36  ;;  %v553_v13 = vrot.slane %v545_v9, %v1393_v28 }
  0x28   :  { %1212 = vmatmul.mubr.msk.bf16.gmra.mxu0 %vm567_vm1, %v365_v5  ;;  %v544_v5 = vrot.slane %v516_v60, %v1393_v28 }
  0x29   :  { %671 = vmatprep.mubr.bf16.mxu0 %v1302_v2 }
  0x2a   :  { %977 = vmatpush1.bf16.msra.mxu1 %v1274_v44  ;;  %v546_v10 = vcombine.low %v537_v0, %v544_v5 }
  0x2b   :  { %978 = vmatprep.subr.bf16.mxu1 %v1275_v50 }
  0x2c   :  { %v560_v14 = vrot.slane %v546_v10, %v1393_v28  ;;  %v1292_v28 = vld [vmem:[%s1861_s3 + $0xb0] ss:$8 sps:$4 sm:$0xff]  }
  0x2e   :  { %979 = vmatpush1.bf16.msra.mxu1 %v1277_v56  ;;  %v561_v17 = vcombine.low %v553_v13, %v560_v14 }
  0x2f   :  { %980 = vmatprep.subr.bf16.mxu1 %v1278_v61 }
  0x30   :  { %1213 = vmatmul.mubr.msk.bf16.gmra.mxu0 %vm567_vm1, %v414_v32 }
  0x31   :  { %681 = vmatprep.mubr.bf16.mxu0 %v1302_v2 }
  0x32   :  { %981 = vmatpush2.bf16.msra.mxu1 %v1280_v1 }
  0x33   :  { %982 = vmatprep.subr.bf16.mxu1 %v1281_v6 }
  0x36   :  { %983 = vmatpush2.bf16.msra.mxu1 %v1283_v7 }
  0x37   :  { %984 = vmatprep.subr.bf16.mxu1 %v1284_v11 }
  0x38   :  { %1214 = vmatmul.mubr.msk.bf16.gmra.mxu0 %vm567_vm1, %v463_v57 }
  0x39   :  { %691 = vmatprep.mubr.bf16.mxu0 %v1302_v2 }
  0x3a   :  { %985 = vmatpush2.bf16.msra.mxu1 %v1286_v12 }
  0x3b   :  { %986 = vmatprep.subr.bf16.mxu1 %v1287_v15 }
  0x3e   :  { %987 = vmatpush2.bf16.msra.mxu1 %v1289_v16 }
  0x3f   :  { %988 = vmatprep.subr.bf16.mxu1 %v1290_v18 }
  0x40   :  { %1215 = vmatmul.mubr.msk.bf16.gmra.mxu0 %vm567_vm1, %v512_v8 }
  0x41   :  { %701 = vmatprep.mubr.bf16.mxu0 %v1302_v2  ;;  %v1293_v2 = vld [vmem:[%s1861_s3 + $0xa4] ss:$8 sps:$4 sm:$0xff]  }
  0x42   :  { %989 = vmatpush2.bf16.msra.mxu1 %v1292_v28 }
  0x43   :  { %990 = vmatprep.subr.bf16.mxu1 %v1293_v2 }
  0x46   :  { %991 = vmatpush2.bf16.msra.mxu1 %v1295_v20 }
  0x47   :  { %992 = vmatprep.subr.bf16.mxu1 %v1296_v21 }
  0x48   :  { %1216 = vmatmul.mubr.msk.bf16.gmra.mxu0 %vm567_vm1, %v561_v17 }
  0x4a   :  { %993 = vmatpush2.bf16.msra.mxu1 %v1298_v22 }
  0x4b   :  { %994 = vmatprep.subr.bf16.mxu1 %v1299_v23 }
  0x4e   :  { %995 = vmatpush2.bf16.msra.mxu1 %v1301_v24 }
  0xd0   :  { %v633_v29 = vpop.f32.mrf.mxu0 }
  0xd1   :  { %v634_v19 = vadd.f32 %v633_v29, %v1720_v31 }
  0xd2   :  { %v635_v32 = vpop.f32.mrf.mxu0 }
  0xd3   :  { %v636_v34 = vadd.f32 %v635_v32, %v1717_v30  ;;  %v712_v42 = vmax.f32 %v634_v19, 0.0 }
  0xd4   :  { %v637_v33 = vpop.f32.mrf.mxu0 }
  0xd5   :  { %v638_v35 = vadd.f32 %v637_v33, %v1720_v31  ;;  %v713_v40 = vmax.f32 %v636_v34, 0.0 }
  0xd6   :  { %v639_v36 = vpop.f32.mrf.mxu0 }
  0xd7   :  { %v640_v37 = vadd.f32 %v639_v36, %v1717_v30  ;;  %v714_v38 = vmax.f32 %v638_v35, 0.0 }
  0xd8   :  { %v643_v39 = vpop.f32.mrf.mxu0 }
  0xd9   :  { %v715_v41 = vmax.f32 %v640_v37, 0.0  ;;  %v744_v45 = vpack.c.bf16 %v714_v38, %v712_v42  ;;  %v644_v49 = vadd.f32 %v643_v39, %v1720_v31 }
  0xda   :  { %v645_v43 = vpop.f32.mrf.mxu0 }
  0xdb   :  { %v745_v44 = vpack.c.bf16 %v715_v41, %v713_v40  ;;  %v646_v47 = vadd.f32 %v645_v43, %v1717_v30  ;;  %v716_v56 = vmax.f32 %v644_v49, 0.0 }
  0xdc   :  { %v647_v46 = vpop.f32.mrf.mxu0 }
  0xdd   :  { %v648_v48 = vadd.f32 %v647_v46, %v1720_v31  ;;  %996 = vmatprep.mubr.bf16.mxu1 %v745_v44  ;;  %v717_v54 = vmax.f32 %v646_v47, 0.0 }
  0xde   :  { %v649_v50 = vpop.f32.mrf.mxu0  ;;  %997 = vmatmul.mubr.bf16.vlgmr.msra.gmra.mxu1 %v744_v45 }
  0xdf   :  { %v650_v51 = vadd.f32 %v649_v50, %v1717_v30  ;;  %v718_v52 = vmax.f32 %v648_v48, 0.0 }
  0xe0   :  { %v653_v53 = vpop.f32.mrf.mxu0 }
  0xe1   :  { %v719_v55 = vmax.f32 %v650_v51, 0.0  ;;  %v746_v59 = vpack.c.bf16 %v718_v52, %v716_v56  ;;  %v654_v63 = vadd.f32 %v653_v53, %v1720_v31 }
  0xe2   :  { %v655_v57 = vpop.f32.mrf.mxu0 }
  0xe3   :  { %v747_v58 = vpack.c.bf16 %v719_v55, %v717_v54  ;;  %v656_v61 = vadd.f32 %v655_v57, %v1717_v30  ;;  %v720_v7 = vmax.f32 %v654_v63, 0.0 }
  0xe4   :  { %v657_v60 = vpop.f32.mrf.mxu0 }
  0xe5   :  { %v658_v62 = vadd.f32 %v657_v60, %v1720_v31  ;;  %1006 = vmatprep.mubr.bf16.mxu1 %v747_v58  ;;  %v721_v5 = vmax.f32 %v656_v61, 0.0 }
  0xe6   :  { %v659_v0 = vpop.f32.mrf.mxu0  ;;  %1007 = vmatmul.mubr.bf16.gmra.mxu1 %v746_v59 }
  0xe7   :  { %v660_v1 = vadd.f32 %v659_v0, %v1717_v30  ;;  %v722_v3 = vmax.f32 %v658_v62, 0.0 }
  0xe8   :  { %v663_v4 = vpop.f32.mrf.mxu0 }
  0xe9   :  { %v723_v6 = vmax.f32 %v660_v1, 0.0  ;;  %v748_v10 = vpack.c.bf16 %v722_v3, %v720_v7  ;;  %v664_v14 = vadd.f32 %v663_v4, %v1720_v31 }
  0xea   :  { %v665_v8 = vpop.f32.mrf.mxu0 }
  0xeb   :  { %v749_v9 = vpack.c.bf16 %v723_v6, %v721_v5  ;;  %v666_v12 = vadd.f32 %v665_v8, %v1717_v30  ;;  %v724_v20 = vmax.f32 %v664_v14, 0.0 }
  0xec   :  { %v667_v11 = vpop.f32.mrf.mxu0 }
  0xed   :  { %v668_v13 = vadd.f32 %v667_v11, %v1720_v31  ;;  %1016 = vmatprep.mubr.bf16.mxu1 %v749_v9  ;;  %v725_v28 = vmax.f32 %v666_v12, 0.0 }
  0xee   :  { %v669_v15 = vpop.f32.mrf.mxu0  ;;  %1017 = vmatmul.mubr.bf16.gmra.mxu1 %v748_v10 }
  0xef   :  { %v670_v16 = vadd.f32 %v669_v15, %v1717_v30  ;;  %v726_v17 = vmax.f32 %v668_v13, 0.0 }
  0xf0   :  { %v673_v18 = vpop.f32.mrf.mxu0 }
  0xf1   :  { %v727_v2 = vmax.f32 %v670_v16, 0.0  ;;  %v750_v23 = vpack.c.bf16 %v726_v17, %v724_v20  ;;  %v674_v32 = vadd.f32 %v673_v18, %v1720_v31 }
  0xf2   :  { %v675_v21 = vpop.f32.mrf.mxu0 }
  0xf3   :  { %v751_v22 = vpack.c.bf16 %v727_v2, %v725_v28  ;;  %v676_v27 = vadd.f32 %v675_v21, %v1717_v30  ;;  %v728_v38 = vmax.f32 %v674_v32, 0.0  ;;  %v1757_v28 = vld [vmem:[%s1863_s5] sm:$0x3]  ;;  %v12_v21 = vstv %s1864_s6 }
  0xf4   :  { %v677_v24 = vpop.f32.mrf.mxu0  ;;  %13 = vst [vmem:[#allocation2] sm:$0x1] %v12_v21 }
  0xf5   :  { %v678_v29 = vadd.f32 %v677_v24, %v1720_v31  ;;  %1026 = vmatprep.mubr.bf16.mxu1 %v751_v22  ;;  %v729_v36 = vmax.f32 %v676_v27, 0.0 }
  0xf6   :  { %v679_v33 = vpop.f32.mrf.mxu0  ;;  %1027 = vmatmul.mubr.bf16.gmra.mxu1 %v750_v23 }
  0xf7   :  { %v680_v34 = vadd.f32 %v679_v33, %v1717_v30  ;;  %v730_v35 = vmax.f32 %v678_v29, 0.0 }
  0xf8   :  { %v683_v19 = vpop.f32.mrf.mxu0 }
  0xf9   :  { %v731_v37 = vmax.f32 %v680_v34, 0.0  ;;  %v752_v41 = vpack.c.bf16 %v730_v35, %v728_v38  ;;  %v684_v45 = vadd.f32 %v683_v19, %v1720_v31 }
  0xfa   :  { %v685_v39 = vpop.f32.mrf.mxu0 }
  0xfb   :  { %v753_v40 = vpack.c.bf16 %v731_v37, %v729_v36  ;;  %v686_v43 = vadd.f32 %v685_v39, %v1717_v30  ;;  %v732_v52 = vmax.f32 %v684_v45, 0.0  ;;  %v1110_v29 = vld [vmem:[#allocation2] sm:$0x1] }
  0xfc   :  { %v687_v42 = vpop.f32.mrf.mxu0  ;;  %1113 = vperm.xlu0 %1251, %v1110_v29  }
  0xfd   :  { %v688_v44 = vadd.f32 %v687_v42, %v1720_v31  ;;  %1036 = vmatprep.mubr.bf16.mxu1 %v753_v40  ;;  %v733_v50 = vmax.f32 %v686_v43, 0.0 }
  0xfe   :  { %v689_v46 = vpop.f32.mrf.mxu0  ;;  %1037 = vmatmul.mubr.bf16.gmra.mxu1 %v752_v41 }
  0xff   :  { %v690_v47 = vadd.f32 %v689_v46, %v1717_v30  ;;  %v734_v48 = vmax.f32 %v688_v44, 0.0 }
 0x100   :  { %v693_v49 = vpop.f32.mrf.mxu0 }
 0x101   :  { %v735_v51 = vmax.f32 %v690_v47, 0.0  ;;  %v754_v55 = vpack.c.bf16 %v734_v48, %v732_v52  ;;  %v694_v59 = vadd.f32 %v693_v49, %v1720_v31 }
 0x102   :  { %v695_v53 = vpop.f32.mrf.mxu0 }
 0x103   :  { %v755_v54 = vpack.c.bf16 %v735_v51, %v733_v50  ;;  %v696_v57 = vadd.f32 %v695_v53, %v1717_v30  ;;  %v736_v3 = vmax.f32 %v694_v59, 0.0  ;;  %v792_v53 = vld [vmem:[%s1865_s4] sm:$0x3] }
 0x104   :  { %v697_v56 = vpop.f32.mrf.mxu0 }
 0x105   :  { %v698_v58 = vadd.f32 %v697_v56, %v1720_v31  ;;  %1046 = vmatprep.mubr.bf16.mxu1 %v755_v54  ;;  %v737_v0 = vmax.f32 %v696_v57, 0.0  ;;  %v1803_v57 = vrot.slane %v792_v53, %v1708_v25 }
 0x106   :  { %v699_v60 = vpop.f32.mrf.mxu0  ;;  %1047 = vmatmul.mubr.bf16.gmra.mxu1 %v754_v55  ;;  %v1800_v55 = vrot.slane %v792_v53, %v1711_v26 }
 0x107   :  { %v700_v61 = vadd.f32 %v699_v60, %v1717_v30  ;;  %v738_v62 = vmax.f32 %v698_v58, 0.0 }
 0x108   :  { %v703_v63 = vpop.f32.mrf.mxu0 }
 0x109   :  { %v739_v1 = vmax.f32 %v700_v61, 0.0  ;;  %v756_v6 = vpack.c.bf16 %v738_v62, %v736_v3  ;;  %v704_v10 = vadd.f32 %v703_v63, %v1720_v31 }
 0x10a   :  { %v705_v4 = vpop.f32.mrf.mxu0 }
 0x10b   :  { %v757_v5 = vpack.c.bf16 %v739_v1, %v737_v0  ;;  %v706_v8 = vadd.f32 %v705_v4, %v1717_v30  ;;  %v740_v16 = vmax.f32 %v704_v10, 0.0 }
 0x10c   :  { %v707_v7 = vpop.f32.mrf.mxu0 }
 0x10d   :  { %v708_v9 = vadd.f32 %v707_v7, %v1720_v31  ;;  %1056 = vmatprep.mubr.bf16.mxu1 %v757_v5  ;;  %v741_v14 = vmax.f32 %v706_v8, 0.0  ;;  %v1128_v31 = vrot.slane %v1757_v28, %v1708_v25 }
 0x10e   :  { %v709_v11 = vpop.f32.mrf.mxu0  ;;  %1057 = vmatmul.mubr.bf16.gmra.mxu1 %v756_v6 }
 0x10f   :  { %v710_v12 = vadd.f32 %v709_v11, %v1717_v30  ;;  %v742_v13 = vmax.f32 %v708_v9, 0.0  ;;  %1195 = vmatprep.mubr.f32.mxu0 %v1128_v31 }
 0x111   :  { %v743_v15 = vmax.f32 %v710_v12, 0.0  ;;  %v758_v18 = vpack.c.bf16 %v742_v13, %v740_v16 }
 0x113   :  { %v759_v17 = vpack.c.bf16 %v743_v15, %v741_v14 }
 0x115   :  { %1066 = vmatprep.mubr.bf16.mxu1 %v759_v17 }
 0x116   :  { %1067 = vmatmul.mubr.bf16.gmra.mxu1 %v758_v18 }
 0x19e   :  { %v1759_v2 = vpop.f32.mrf.mxu1 }
 0x1a0   :  { %v1763_v20 = vpop.f32.mrf.mxu1 }
 0x1a2   :  { %v1765_v30 = vpop.f32.mrf.mxu1 }
 0x1a4   :  { %v1770_v22 = vpop.f32.mrf.mxu1 }
 0x1a6   :  { %v1772_v23 = vpop.f32.mrf.mxu1 }
 0x1a8   :  { %v1774_v24 = vpop.f32.mrf.mxu1 }
 0x1aa   :  { %v1776_v27 = vpop.f32.mrf.mxu1 }
 0x1ac   :  { %v1778_v32 = vpop.f32.mrf.mxu1 }
 0x1ae   :  { %v1780_v33 = vpop.f32.mrf.mxu1 }
 0x1b0   :  { %v1782_v34 = vpop.f32.mrf.mxu1 }
 0x1b2   :  { %v1784_v35 = vpop.f32.mrf.mxu1 }
 0x1b4   :  { %v1786_v19 = vpop.f32.mrf.mxu1 }
 0x1b6   :  { %v1788_v36 = vpop.f32.mrf.mxu1 }
 0x1b8   :  { %v1790_v37 = vpop.f32.mrf.mxu1 }
 0x1ba   :  { %v1792_v38 = vpop.f32.mrf.mxu1 }
 0x1bc   :  { %v1794_v39 = vpop.f32.mrf.mxu1 }
 0x1be   :  { %v1038_v40 = vpop.f32.mrf.mxu1 }
 0x1c0   :  { %v1040_v41 = vpop.f32.mrf.mxu1 }
 0x1c1   :  { %v1041_v29 = vadd.f32 %v1040_v41, %v1803_v57 }
 0x1c2   :  { %v1042_v42 = vpop.f32.mrf.mxu1 }
 0x1c3   :  { %v1043_v31 = vadd.f32 %v1042_v42, %v1800_v55  ;;  %v1031_v42 = vadd.f32 %v1790_v37, %v1803_v57  ;;  %v1021_v37 = vadd.f32 %v1782_v34, %v1803_v57  ;;  %v1011_v34 = vadd.f32 %v1774_v24, %v1803_v57 }
 0x1c4   :  { %v1044_v43 = vpop.f32.mrf.mxu1  ;;  %v1001_v24 = vadd.f32 %v1763_v20, %v1803_v57 }
 0x1c5   :  { %v1045_v17 = vadd.f32 %v1044_v43, %v1803_v57  ;;  %v1033_v43 = vadd.f32 %v1792_v38, %v1800_v55  ;;  %v1023_v38 = vadd.f32 %v1784_v35, %v1800_v55  ;;  %v1013_v35 = vadd.f32 %v1776_v27, %v1800_v55 }
 0x1c6   :  { %v1048_v44 = vpop.f32.mrf.mxu1  ;;  %v1003_v27 = vadd.f32 %v1765_v30, %v1800_v55  ;;  %v1114_v30 = vpop.permute.xlu0 %1113 }
 0x1c7   :  { %v1049_v15 = vadd.f32 %v1048_v44, %v1800_v55  ;;  %v1035_v44 = vadd.f32 %v1794_v39, %v1803_v57  ;;  %v1025_v39 = vadd.f32 %v1786_v19, %v1803_v57  ;;  %v1015_v19 = vadd.f32 %v1778_v32, %v1803_v57 }
 0x1c8   :  { %v1050_v45 = vpop.f32.mrf.mxu1  ;;  %v1005_v32 = vadd.f32 %v1770_v22, %v1803_v57 }
 0x1c9   :  { %v1051_v13 = vadd.f32 %v1050_v45, %v1803_v57  ;;  %v1097_v21 = vmax.f32 %v1049_v15, 0.0  ;;  %v1039_v45 = vadd.f32 %v1038_v40, %v1800_v55  ;;  %v1092_v41 = vmax.f32 %v1035_v44, 0.0 }
 0x1ca   :  { %v1052_v46 = vpop.f32.mrf.mxu1  ;;  %v1029_v40 = vadd.f32 %v1788_v36, %v1800_v55  ;;  %v1088_v53 = vmax.f32 %v1025_v39, 0.0  ;;  %v1019_v36 = vadd.f32 %v1780_v33, %v1800_v55  ;;  %v1009_v33 = vadd.f32 %v1772_v23, %v1800_v55 }
 0x1cb   :  { %v1053_v11 = vadd.f32 %v1052_v46, %v1800_v55  ;;  %v1098_v18 = vmax.f32 %v1051_v13, 0.0  ;;  %v1096_v46 = vmax.f32 %v1045_v17, 0.0  ;;  %v999_v23 = vadd.f32 %v1759_v2, %v1800_v55 }
 0x1cc   :  { %v1054_v47 = vpop.f32.mrf.mxu1 }
 0x1cd   :  { %v1055_v9 = vadd.f32 %v1054_v47, %v1803_v57  ;;  %v1099_v16 = vmax.f32 %v1053_v11, 0.0  ;;  %v1095_v47 = vmax.f32 %v1043_v31, 0.0  ;;  %v1077_v22 = vmax.f32 %v999_v23, 0.0 }
 0x1ce   :  { %v1058_v48 = vpop.f32.mrf.mxu1 }
 0x1cf   :  { %v1059_v7 = vadd.f32 %v1058_v48, %v1800_v55  ;;  %v1100_v14 = vmax.f32 %v1055_v9, 0.0  ;;  %v1094_v48 = vmax.f32 %v1041_v29, 0.0 }
 0x1d0   :  { %v1060_v49 = vpop.f32.mrf.mxu1 }
 0x1d1   :  { %v1061_v5 = vadd.f32 %v1060_v49, %v1803_v57  ;;  %v1101_v12 = vmax.f32 %v1059_v7, 0.0  ;;  %v1093_v49 = vmax.f32 %v1039_v45, 0.0 }
 0x1d2   :  { %v1062_v50 = vpop.f32.mrf.mxu1 }
 0x1d3   :  { %v1063_v25 = vadd.f32 %v1062_v50, %v1800_v55  ;;  %v1102_v10 = vmax.f32 %v1061_v5, 0.0  ;;  %v1091_v50 = vmax.f32 %v1033_v43, 0.0 }
 0x1d4   :  { %v1064_v51 = vpop.f32.mrf.mxu1 }
 0x1d5   :  { %v1065_v1 = vadd.f32 %v1064_v51, %v1803_v57  ;;  %v1103_v8 = vmax.f32 %v1063_v25, 0.0  ;;  %v1090_v51 = vmax.f32 %v1031_v42, 0.0  ;;  %v1119_v25 = vrot.slane %v1114_v30, %v1711_v26 }
 0x1d6   :  { %v1068_v52 = vpop.f32.mrf.mxu1 }
 0x1d7   :  { %v1069_v63 = vadd.f32 %v1068_v52, %v1800_v55  ;;  %v1104_v6 = vmax.f32 %v1065_v1, 0.0  ;;  %v1089_v52 = vmax.f32 %v1029_v40, 0.0  ;;  %v1078_v1 = vmax.f32 %v1001_v24, 0.0 }
 0x1d8   :  { %v1070_v54 = vpop.f32.mrf.mxu1 }
 0x1d9   :  { %v1071_v60 = vadd.f32 %v1070_v54, %v1803_v57  ;;  %v1105_v4 = vmax.f32 %v1069_v63, 0.0  ;;  %v1087_v54 = vmax.f32 %v1023_v38, 0.0  ;;  %v1080_v63 = vmax.f32 %v1005_v32, 0.0 }
 0x1da   :  { %v1072_v56 = vpop.f32.mrf.mxu1 }
 0x1db   :  { %v1073_v58 = vadd.f32 %v1072_v56, %v1800_v55  ;;  %v1106_v3 = vmax.f32 %v1071_v60, 0.0  ;;  %v1086_v56 = vmax.f32 %v1021_v37, 0.0  ;;  %v1083_v60 = vmax.f32 %v1013_v35, 0.0 }
 0x1dc   :  { %v1074_v59 = vpop.f32.mrf.mxu1 }
 0x1dd   :  { %v1075_v61 = vadd.f32 %v1074_v59, %v1803_v57  ;;  %v1107_v0 = vmax.f32 %v1073_v58, 0.0  ;;  %v1085_v58 = vmax.f32 %v1019_v36, 0.0  ;;  %v1084_v59 = vmax.f32 %v1015_v19, 0.0 }
 0x1df   :  { %v1108_v62 = vmax.f32 %v1075_v61, 0.0  ;;  %v1082_v61 = vmax.f32 %v1011_v34, 0.0 }
 0x1e1   :  { %1131 = vmatprep.subr.mxu0 %v1108_v62  ;;  %v1081_v62 = vmax.f32 %v1009_v33, 0.0 }
 0x1e2   :  { %1132 = vmatpush1.xpose.msra.mxu0 %v1107_v0  ;;  %v1079_v0 = vmax.f32 %v1003_v27, 0.0 }
 0x1e3   :  { %1133 = vmatprep.subr.mxu0 %v1106_v3  ;;  %v1124_v3 = vrot.slane %v1757_v28, %v1711_v26 }
 0x1e6   :  { %1134 = vmatpush1.xpose.msra.mxu0 %v1105_v4 }
 0x1e7   :  { %1135 = vmatprep.subr.mxu0 %v1104_v6 }
 0x1ea   :  { %1136 = vmatpush1.xpose.msra.mxu0 %v1103_v8 }
 0x1eb   :  { %1137 = vmatprep.subr.mxu0 %v1102_v10 }
 0x1ee   :  { %1138 = vmatpush1.xpose.msra.mxu0 %v1101_v12 }
 0x1ef   :  { %1139 = vmatprep.subr.mxu0 %v1100_v14 }
 0x1f2   :  { %1140 = vmatpush1.xpose.msra.mxu0 %v1099_v16 }
 0x1f3   :  { %1141 = vmatprep.subr.mxu0 %v1098_v18 }
 0x1f6   :  { %1142 = vmatpush1.xpose.msra.mxu0 %v1097_v21 }
 0x1f7   :  { %1143 = vmatprep.subr.mxu0 %v1096_v46 }
 0x1fa   :  { %1144 = vmatpush1.xpose.msra.mxu0 %v1095_v47 }
 0x1fb   :  { %1145 = vmatprep.subr.mxu0 %v1094_v48 }
 0x1fe   :  { %1146 = vmatpush1.xpose.msra.mxu0 %v1093_v49 }
 0x1ff   :  { %1147 = vmatprep.subr.mxu0 %v1092_v41 }
 0x202   :  { %1148 = vmatpush1.xpose.msra.mxu0 %v1091_v50 }
 0x203   :  { %1149 = vmatprep.subr.mxu0 %v1090_v51 }
 0x206   :  { %1150 = vmatpush1.xpose.msra.mxu0 %v1089_v52 }
 0x207   :  { %1151 = vmatprep.subr.mxu0 %v1088_v53 }
 0x20a   :  { %1152 = vmatpush1.xpose.msra.mxu0 %v1087_v54 }
 0x20b   :  { %1153 = vmatprep.subr.mxu0 %v1086_v56 }
 0x20e   :  { %1154 = vmatpush1.xpose.msra.mxu0 %v1085_v58 }
 0x20f   :  { %1155 = vmatprep.subr.mxu0 %v1084_v59 }
 0x212   :  { %1156 = vmatpush1.xpose.msra.mxu0 %v1083_v60 }
 0x213   :  { %1157 = vmatprep.subr.mxu0 %v1082_v61 }
 0x216   :  { %1158 = vmatpush1.xpose.msra.mxu0 %v1081_v62 }
 0x217   :  { %1159 = vmatprep.subr.mxu0 %v1080_v63 }
 0x21a   :  { %1160 = vmatpush1.xpose.msra.mxu0 %v1079_v0 }
 0x21b   :  { %1161 = vmatprep.subr.mxu0 %v1078_v1 }
 0x21e   :  { %1162 = vmatpush1.xpose.msra.mxu0 %v1077_v22 }
 0x221   :  { %1196 = vmatmul.mubr.f32.vlgmr.msra.gmra.mxu0 %v1124_v3 }
 0x2e1   :  { %v1197_v20 = vpop.f32.mrf.mxu0 }
 0x2e2   :  { %v1198_v57 = vadd.f32 %v1197_v20, %v1119_v25 }
 0x2e3   :  { %v1199_v4 = vpop.f32.mrf.mxu0 }
 0x2e4   :  { %1201 = vst [vmem:[%s1866_s7] sm:$0x1] %v1198_v57 }

</bundles_post_ra>
